<compile_context>
chip_gen: v7x
topology: tpu7x:2x2x1
jax: 0.10.0
libtpu: 0.0.40
codegen_flags: <defaults>
</compile_context>

<pallas_src>
import functools

import jax
import jax.numpy as jnp
from jax.experimental import pallas as pl
from jax.experimental.pallas import tpu as pltpu


def _vmem_budget_and_limit():
    """Per-generation VMEM sizing (v7x: 64 MiB physical, v5e/v6e: 128 MiB)."""
    phys = 128 * 1024 * 1024
    try:
        phys = int(pltpu.get_tpu_info().vmem_capacity_bytes)
    except Exception:
        pass
    budget = min(phys // 4, 24 * 1024 * 1024)   # used for tile sizing
    limit = min(phys // 2, 48 * 1024 * 1024)    # scoped limit handed to Mosaic
    return budget, limit


def _choose_tile_rows(D, itemsize, budget_bytes):
    """Largest batch tile (multiple of 32) whose working set fits the budget."""
    lanes = -(-D // 128) * 128                  # VMEM lane padding of the last dim
    per_row = 2 * 2 * itemsize * lanes          # o1/o2 x double-buffered blocks
    per_row += 4 * 4 * lanes                    # f32 temporaries over (tb, D)
    per_row += 128                              # target blocks + (1, tb) temps
    # TODO(synk): for extremely large D (per_row > budget) add a D grid axis
    # instead of relying on the 32-row floor below.
    tb = budget_bytes // per_row
    tb = (tb // 32) * 32                        # sublane-safe for f32/bf16/int8
    return max(tb, 32)


def _contrastive_loss_kernel(t_ref, o1_ref, o2_ref, out_ref, *, margin, eps,
                             tile_rows, total_rows, ragged):
    o1 = o1_ref[...].astype(jnp.float32)        # (tb, D)
    o2 = o2_ref[...].astype(jnp.float32)        # (tb, D)
    t = t_ref[...]                              # (1, tb) float32 (lane-dense)

    diff = o2 - o1
    sq = diff * diff

    # Row-sum over D on the (otherwise idle) MXU, emitted directly in the
    # lane-dense (1, tb) orientation: contract the D axis of both operands.
    ones = jnp.ones((1, sq.shape[1]), jnp.float32)
    d = jax.lax.dot_general(ones, sq, (((1,), (1,)), ((), ())),
                            preferred_element_type=jnp.float32)     # (1, tb)

    hinge = jnp.maximum(margin - jnp.sqrt(d + eps), 0.0)            # EUP sqrt
    losses = 0.5 * (t * d + (1.0 - t) * hinge * hinge)              # (1, tb)

    if ragged:
        i = pl.program_id(0)
        last = pl.num_programs(0) - 1

        @pl.when(i < last)
        def _():
            out_ref[...] = jnp.sum(losses, keepdims=True)

        @pl.when(i == last)
        def _():
            # Only the last tile can read past B; select (not multiply) so any
            # NaN/Inf in the unspecified out-of-bounds rows cannot leak.
            lane = jax.lax.broadcasted_iota(jnp.int32, losses.shape, 1)
            valid = (i * tile_rows + lane) < total_rows
            out_ref[...] = jnp.sum(jnp.where(valid, losses, 0.0), keepdims=True)
    else:
        out_ref[...] = jnp.sum(losses, keepdims=True)


def contrastive_loss(output1, output2, target, margin, eps=1e-9,
                     size_average=True, tile_rows=None):
    """output1, output2: (B, D); target: (B,). Returns a float32 scalar."""
    B, D = output1.shape
    itemsize = jnp.dtype(output1.dtype).itemsize
    budget, vmem_limit = _vmem_budget_and_limit()

    if tile_rows is None:
        tb = _choose_tile_rows(D, itemsize, budget)
    else:
        tb = max(32, (int(tile_rows) // 32) * 32)
    if tb >= B:
        tb = B                                   # single full-array block
    num_tiles = -(-B // tb)
    ragged = (num_tiles * tb) != B

    # Lane-dense target layout: (num_tiles, tb), one contiguous row per tile.
    # This only copies B floats (negligible), unlike padding output1/output2.
    t = target.astype(jnp.float32).reshape(-1)
    pad = num_tiles * tb - B
    if pad:
        t = jnp.pad(t, (0, pad))
    t = t.reshape(num_tiles, tb)

    kernel = functools.partial(
        _contrastive_loss_kernel,
        margin=float(margin),
        eps=float(eps),
        tile_rows=tb,
        total_rows=B,
        ragged=ragged,
    )

    partial_sums = pl.pallas_call(
        kernel,
        out_shape=jax.ShapeDtypeStruct((num_tiles, 1), jnp.float32),
        grid_spec=pltpu.PrefetchScalarGridSpec(
            num_scalar_prefetch=0,
            grid=(num_tiles,),
            in_specs=[
                pl.BlockSpec((1, tb), lambda i: (i, 0)),    # target (lane-dense)
                pl.BlockSpec((tb, D), lambda i: (i, 0)),    # output1 (full D)
                pl.BlockSpec((tb, D), lambda i: (i, 0)),    # output2 (full D)
            ],
            out_specs=pl.BlockSpec((1, 1), lambda i: (i, 0)),
        ),
        compiler_params=pltpu.CompilerParams(
            dimension_semantics=("parallel",),              # megacore on v7x
            vmem_limit_bytes=vmem_limit,
        ),
    )(t, output1, output2)

    total = jnp.sum(partial_sums)
    return total / B if size_average else total


def _reference(output1, output2, target, margin, eps=1e-9, size_average=True):
    o1 = output1.astype(jnp.float32)
    o2 = output2.astype(jnp.float32)
    tt = target.astype(jnp.float32)
    d = jnp.sum((o2 - o1) ** 2, axis=1)
    hinge = jnp.maximum(margin - jnp.sqrt(d + eps), 0.0)
    losses = 0.5 * (tt * d + (1.0 - tt) * hinge * hinge)
    return jnp.mean(losses) if size_average else jnp.sum(losses)


if __name__ == "__main__":
    margin = 1.0
    key = jax.random.PRNGKey(0)
    k1, k2, k3, k4, k5, k6 = jax.random.split(key, 6)

    # Case 1: small single-tile batch (B=8, D=32), f32, mean reduction.
    B, D = 8, 32
    o1 = 0.1 * jax.random.normal(k1, (B, D), dtype=jnp.float32)
    o2 = 0.1 * jax.random.normal(k2, (B, D), dtype=jnp.float32)
    tgt = jax.random.bernoulli(k3, 0.5, (B,)).astype(jnp.float32)
    got = contrastive_loss(o1, o2, tgt, margin)
    jax.block_until_ready(got)
    want = _reference(o1, o2, tgt, margin)
    assert jnp.allclose(got, want, rtol=2e-2, atol=1e-3), (got, want)

    # Case 2: multi-tile with a ragged last tile (masked path), sum reduction.
    B2, D2 = 200, 32
    o1b = 0.1 * jax.random.normal(k4, (B2, D2), dtype=jnp.float32)
    o2b = 0.1 * jax.random.normal(k5, (B2, D2), dtype=jnp.float32)
    tgt2 = jax.random.bernoulli(k6, 0.5, (B2,)).astype(jnp.float32)
    got2 = contrastive_loss(o1b, o2b, tgt2, margin, size_average=False,
                            tile_rows=64)
    jax.block_until_ready(got2)
    want2 = _reference(o1b, o2b, tgt2, margin, size_average=False)
    assert jnp.allclose(got2, want2, rtol=2e-2, atol=1e-2), (got2, want2)

    # Case 3: bf16 inputs through the same multi-tile path, mean reduction.
    got3 = contrastive_loss(o1b.astype(jnp.bfloat16), o2b.astype(jnp.bfloat16),
                            tgt2, margin, tile_rows=64)
    jax.block_until_ready(got3)
    want3 = _reference(o1b.astype(jnp.bfloat16), o2b.astype(jnp.bfloat16),
                       tgt2, margin)
    assert jnp.allclose(got3, want3, rtol=2e-2, atol=1e-3), (got3, want3)

    print("KERNEL_OK")
</pallas_src>

<mosaic_0001>
module attributes {stable_mosaic.version = 11 : i64} {
  func.func @_contrastive_loss_kernel(%arg0: i32, %arg1: memref<1x8xf32, #tpu.memory_space<vmem>>, %arg2: memref<8x32xf32, #tpu.memory_space<vmem>>, %arg3: memref<8x32xf32, #tpu.memory_space<vmem>>, %arg4: memref<1x1xf32, #tpu.memory_space<vmem>>) attributes {dimension_semantics = [#tpu.dimension_semantics<parallel>], iteration_bounds = array<i64: 1>, scalar_prefetch = 0 : i64, scratch_operands = 0 : i64, tpu.core_type = #tpu.core_type<tc>, window_params = [{transform_indices = @transform_0, window_bounds = array<i64: 1, 8>}, {transform_indices = @transform_1, window_bounds = array<i64: 8, 32>}, {transform_indices = @transform_2, window_bounds = array<i64: 8, 32>}, {transform_indices = @transform_3, window_bounds = array<i64: 1, 1>}]} {
    %c0 = arith.constant 0 : index
    %c0_0 = arith.constant 0 : index
    %0 = vector.load %arg2[%c0, %c0_0] : memref<8x32xf32, #tpu.memory_space<vmem>>, vector<8x32xf32>
    %c0_1 = arith.constant 0 : index
    %c0_2 = arith.constant 0 : index
    %1 = vector.load %arg3[%c0_1, %c0_2] : memref<8x32xf32, #tpu.memory_space<vmem>>, vector<8x32xf32>
    %c0_3 = arith.constant 0 : index
    %c0_4 = arith.constant 0 : index
    %2 = vector.load %arg1[%c0_3, %c0_4] : memref<1x8xf32, #tpu.memory_space<vmem>>, vector<1x8xf32>
    %3 = arith.subf %1, %0 : vector<8x32xf32>
    %4 = arith.mulf %3, %3 : vector<8x32xf32>
    %cst = arith.constant 1.000000e+00 : f32
    %5 = vector.broadcast %cst : f32 to vector<1x32xf32>
    %cst_5 = arith.constant dense<0.000000e+00> : vector<1x8xf32>
    %6 = tpu.matmul %5, %4, %cst_5 {dimension_numbers = #tpu.dot_dimension_numbers<[1], [1], [0], [0], [0, 0, 1, 0], [], []>} : vector<1x32xf32>, vector<8x32xf32>, vector<1x8xf32> -> vector<1x8xf32>
    %cst_6 = arith.constant 9.99999971E-10 : f32
    %7 = vector.broadcast %cst_6 : f32 to vector<1x8xf32>
    %8 = arith.addf %6, %7 : vector<1x8xf32>
    %9 = math.sqrt %8 : vector<1x8xf32>
    %cst_7 = arith.constant 1.000000e+00 : f32
    %10 = vector.broadcast %cst_7 : f32 to vector<1x8xf32>
    %11 = arith.subf %10, %9 : vector<1x8xf32>
    %cst_8 = arith.constant 0.000000e+00 : f32
    %12 = vector.broadcast %cst_8 : f32 to vector<1x8xf32>
    %13 = arith.maximumf %11, %12 : vector<1x8xf32>
    %14 = arith.mulf %2, %6 : vector<1x8xf32>
    %cst_9 = arith.constant 1.000000e+00 : f32
    %15 = vector.broadcast %cst_9 : f32 to vector<1x8xf32>
    %16 = arith.subf %15, %2 : vector<1x8xf32>
    %17 = arith.mulf %16, %13 : vector<1x8xf32>
    %18 = arith.mulf %17, %13 : vector<1x8xf32>
    %19 = arith.addf %14, %18 : vector<1x8xf32>
    %cst_10 = arith.constant 5.000000e-01 : f32
    %20 = vector.broadcast %cst_10 : f32 to vector<1x8xf32>
    %21 = arith.mulf %20, %19 : vector<1x8xf32>
    %22 = vector.shape_cast %21 : vector<1x8xf32> to vector<1x1x8xf32>
    %cst_11 = arith.constant dense<0.000000e+00> : vector<1xf32>
    %23 = vector.multi_reduction <add>, %22, %cst_11 [1, 2] : vector<1x1x8xf32> to vector<1xf32>
    %24 = vector.shape_cast %23 : vector<1xf32> to vector<1x1x1xf32>
    %25 = vector.extract %24[0, 0, 0] : f32 from vector<1x1x1xf32>
    %26 = vector.broadcast %25 : f32 to vector<1x1xf32>
    %c0_12 = arith.constant 0 : index
    %c0_13 = arith.constant 0 : index
    %27 = vector.load %arg4[%c0_12, %c0_13] : memref<1x1xf32, #tpu.memory_space<vmem>>, vector<1x1xf32>
    tpu.vector_store %arg4[%c0_12, %c0_13], %26 {strides = array<i32>} : memref<1x1xf32, #tpu.memory_space<vmem>>, vector<1x1xf32>,
    return
  }
  func.func @transform_0(%arg0: i32) -> (i32, i32) {
    %c0_i32 = arith.constant 0 : i32
    %c0_i32_0 = arith.constant 0 : i32
    return %arg0, %c0_i32 : i32, i32
  }
  func.func @transform_1(%arg0: i32) -> (i32, i32) {
    %c0_i32 = arith.constant 0 : i32
    %c0_i32_0 = arith.constant 0 : i32
    return %arg0, %c0_i32 : i32, i32
  }
  func.func @transform_2(%arg0: i32) -> (i32, i32) {
    %c0_i32 = arith.constant 0 : i32
    %c0_i32_0 = arith.constant 0 : i32
    return %arg0, %c0_i32 : i32, i32
  }
  func.func @transform_3(%arg0: i32) -> (i32, i32) {
    %c0_i32 = arith.constant 0 : i32
    %c0_i32_0 = arith.constant 0 : i32
    return %arg0, %c0_i32 : i32, i32
  }
}

</mosaic_0001>

<bundles_post_ra>
// kernel: tpu_custom_call.1
= control target key start
LH: loop header
LB: loop body
LE: loop exit
PB: predicated region body
PF: predicated region fallthrough
CT: control target
= control target key end

     0   :  { %8 = vsyncpa [#allocation3], 0  ;;  %s367_s0 = inlined_call_operand.hbm [shape: f32[1,8], index: 0, kind: input, shape index: {}]   ;;  %s368_s1 = inlined_call_operand.hbm [shape: f32[8,32], index: 1, kind: input, shape index: {}]   ;;  %s369_s2 = inlined_call_operand.hbm [shape: f32[8,32], index: 2, kind: input, shape index: {}]   ;;  %s370_s3 = inlined_call_operand.hbm [shape: f32[1,1], index: 3, kind: output, shape index: {}]  }
   0x1   :  { %9 = vsyncpa [#allocation6], 0 }
   0x2   :  { %10 = vsyncpa [#allocation4], 0  ;;  %s292_s12 = smov [#allocation5]   ;;  %s293_s14 = smov [#allocation2]  }
   0x3   :  { %s27_s13 = sshll.u32 %s292_s12, 4  ;;  %s17_s15 = sshll.u32 %s293_s14, 4  ;;  %s28_s13 = int_to_ptr.vmem [resolvable:$true] %s27_s13  ;;  %s18_s15 = int_to_ptr.vmem [resolvable:$true] %s17_s15 }
   0x4   :  { %s198_s18 = scalar_lea.hbm %s368_s1, 128 }
   0x5   :  { %p199_p0 = scmp.ne.s32.totalorder %s368_s1, %s198_s18  ;;  %p202_p1 = scmp.lt.u32.totalorder %s198_s18, %s368_s1 }
   0x7   :  { %p204_p2 = pnand %p202_p1, %p199_p0 }
   0x9   :  { %207 = shalt.err (!%p204_p2)
}
   0xa   :  { %s208_s23 = scalar_lea.vmem %s28_s13, 128  ;;  %p213_p4 = scmp.lt.s32.totalorder %s28_s13, %s28_s13 }
   0xb   :  { %p209_p3 = scmp.ne.s32.totalorder %s28_s13, %s208_s23  ;;  %p214_p5 = scmp.lt.s32.totalorder %s208_s23, %s208_s23 }
   0xd   :  { %p215_p6 = por %p214_p5, %p213_p4 }
   0xf   :  { %p216_p7 = pnand %p215_p6, %p209_p3 }
  0x11   :  { %219 = shalt.err (!%p216_p7)
}
  0x12   :  { %30 = dma.hbm_to_vmem [thread:$0]  %s368_s1, 128, %s28_s13, [#allocation6]  }
  0x13   :  { %s220_s28 = scalar_lea.hbm %s367_s0, 16 }
  0x14   :  { %p221_p8 = scmp.ne.s32.totalorder %s367_s0, %s220_s28  ;;  %p224_p9 = scmp.lt.u32.totalorder %s220_s28, %s367_s0 }
  0x16   :  { %p226_p10 = pnand %p224_p9, %p221_p8 }
  0x18   :  { %229 = shalt.err (!%p226_p10)
}
  0x19   :  { %s230_s6 = scalar_lea.vmem %s18_s15, 16  ;;  %s234_s7 = scalar_lea.vmem %s18_s15, 32 }
  0x1a   :  { %p231_p11 = scmp.ne.s32.totalorder %s18_s15, %s230_s6  ;;  %p235_p12 = scmp.lt.s32.totalorder %s18_s15, %s18_s15 }
  0x1b   :  { %p236_p13 = scmp.lt.s32.totalorder %s234_s7, %s230_s6 }
  0x1d   :  { %p237_p0 = por %p236_p13, %p235_p12 }
  0x1f   :  { %p238_p1 = pnand %p237_p0, %p231_p11 }
  0x21   :  { %241 = shalt.err (!%p238_p1)
}
  0x22   :  { %20 = dma.hbm_to_vmem [thread:$0]  %s367_s0, 16, %s18_s15, [#allocation3]  }
  0x23   :  { %s294_s9 = smov [#allocation7]   ;;  %s242_s13 = scalar_lea.hbm %s369_s2, 128 }
  0x24   :  { %s37_s10 = sshll.u32 %s294_s9, 4  ;;  %p243_p2 = scmp.ne.s32.totalorder %s369_s2, %s242_s13  ;;  %s38_s10 = int_to_ptr.vmem [resolvable:$true] %s37_s10 }
  0x25   :  { %p246_p3 = scmp.lt.u32.totalorder %s242_s13, %s369_s2 }
  0x27   :  { %p248_p4 = pnand %p246_p3, %p243_p2 }
  0x29   :  { %251 = shalt.err (!%p248_p4)
}
  0x2a   :  { %s252_s19 = scalar_lea.vmem %s38_s10, 128  ;;  %p257_p6 = scmp.lt.s32.totalorder %s38_s10, %s38_s10 }
  0x2b   :  { %p253_p5 = scmp.ne.s32.totalorder %s38_s10, %s252_s19  ;;  %p258_p7 = scmp.lt.s32.totalorder %s252_s19, %s252_s19 }
  0x2d   :  { %p259_p8 = por %p258_p7, %p257_p6 }
  0x2f   :  { %p260_p9 = pnand %p259_p8, %p253_p5 }
  0x31   :  { %263 = shalt.err (!%p260_p9)
}
  0x32   :  { %40 = dma.hbm_to_vmem [thread:$0]  %s369_s2, 128, %s38_s10, [#allocation6]  }
  0x33   :  { %286 = dma.done.wait [#allocation3], 16  }
  0x34   :  { %287 = vsyncadd [#allocation3], 4294967280 }
  0x35   :  { %288 = dma.done.wait [#allocation6], 256  }
  0x36   :  { %289 = vsyncadd [#allocation6], 4294967040  ;;  %v295_v0 = vmov 0.0   ;;  %vm296_vm0 = vmmov 0   ;;  %v50_v1 = vld [vmem:[#allocation5] sm:$0xff]  ;;  %v51_v2 = vld [vmem:[#allocation7] sm:$0xff] }
  0x37   :  { %182 = vmatprep.subr.mxu0 %v295_v0  ;;  %184 = vmatprep.mubr.msk.f32.mxu0 %vm296_vm0, %v295_v0  ;;  %v53_v3 = vsub.f32 %v51_v2, %v50_v1  ;;  %vm55_vm1 = vcmask 261120   ;;  %v297_v5 = vmov 1.0   ;;  %v52_v13 = vld [vmem:[#allocation2] sm:$0x1]  ;;  %vm148_vm4 = vcmask 57344   ;;  %s298_s2 = smov [#allocation8]  }
  0x38   :  { %v143_v16 = vsub.f32 1.0, %v52_v13  ;;  %s168_s20 = sshll.u32 %s298_s2, 4  ;;  %vm160_vm5 = vcmask 0   ;;  %s169_s20 = int_to_ptr.vmem [resolvable:$true] %s168_s20 }
  0x39   :  { %v54_v4 = vmul.f32 %v53_v3, %v53_v3  ;;  %s264_s22 = scalar_lea.vmem %s169_s20, 16  ;;  %s268_s23 = scalar_lea.vmem %s169_s20, 32 }
  0x3a   :  { %p265_p10 = scmp.ne.s32.totalorder %s169_s20, %s264_s22  ;;  %p269_p11 = scmp.lt.s32.totalorder %s169_s20, %s169_s20 }
  0x3b   :  { %183 = vmatpush3.xpose.msk.msra.mxu0 %vm55_vm1, %v54_v4  ;;  %p270_p12 = scmp.lt.s32.totalorder %s268_s23, %s264_s22 }
  0x3d   :  { %p271_p13 = por %p270_p12, %p269_p11 }
  0x3e   :  { %185 = vmatmul.mubr.msk.f32.vlgmr.msra.gmra.mrb[0].mxu0 %vm55_vm1, %v297_v5 }
  0x3f   :  { %p272_p0 = pnand %p271_p13, %p265_p10 }
 0x111   :  { %v128_v6 = vpop.f32.mrb[0].mxu0 }
 0x112   :  { %v132_v7 = vadd.f32 1e-09, %v128_v6  ;;  %v186_v8 = vpop.f32.mrb[1].mxu0  ;;  %v142_v19 = vmul.f32 %v128_v6, %v52_v13 }
 0x114   :  { %196 = vrsqrt.f32 %v132_v7  ;;  %vm135_vm2 = vcmp.eq.f32.partialorder %v132_v7, inf  ;;  %v138_v11 = vand.u32 2147483648, %v132_v7  ;;  %vm137_vm3 = vcmp.eq.f32.partialorder %v132_v7, 0.0 }
 0x11e   :  { %v197_v9 = vpop.eup %196 }
 0x11f   :  { %v134_v10 = vmul.f32 %v197_v9, %v132_v7 }
 0x121   :  { %v136_v12 = vsel %vm135_vm2, %v132_v7, %v134_v10 }
 0x122   :  { %v139_v14 = vsel %vm137_vm3, %v138_v11, %v136_v12 }
 0x123   :  { %v140_v15 = vsub.f32 1.0, %v139_v14 }
 0x125   :  { %v141_v17 = vmax.f32 %v140_v15, 0.0 }
 0x127   :  { %v144_v18 = vmul.f32 %v143_v16, %v141_v17 }
 0x129   :  { %v145_v20 = vmul.f32 %v144_v18, %v141_v17 }
 0x12b   :  { %v146_v21 = vadd.f32 %v145_v20, %v142_v19 }
 0x12d   :  { %v147_v22 = vmul.f32 0.5, %v146_v21 }
 0x12f   :  { %v149_v23 = vsel %vm148_vm4, %v147_v22, 0.0 }
 0x130   :  { %150 = vadd.xlane.f32.xlu0 %v149_v23 }
 0x1bd   :  { %v151_v24 = vpop.xlane.xlu0 %150 }
 0x1be   :  { %v152_v25 = vrot.slane %v151_v24, 4 }
 0x1c0   :  { %v153_v26 = vadd.f32 %v152_v25, %v151_v24 }
 0x1c2   :  { %v154_v27 = vrot.slane %v153_v26, 2 }
 0x1c4   :  { %v155_v28 = vadd.f32 %v154_v27, %v153_v26 }
 0x1c6   :  { %v156_v29 = vrot.slane %v155_v28, 1 }
 0x1c8   :  { %v157_v30 = vadd.f32 %v156_v29, %v155_v28 }
 0x1ca   :  { %187 = vpush %v157_v30 }
 0x1fb   :  { %s188_s21 = spop %187 }
 0x1fc   :  { %v159_v31 = vstv %s188_s21 }
 0x1fd   :  { %161 = vst.msk [vmem:[#allocation8] sm:$0x1] %vm160_vm5, %v159_v31 }
 0x1fe   :  { %275 = shalt.err (!%p272_p0)
}
 0x1ff   :  { %s276_s26 = scalar_lea.hbm %s370_s3, 16 }
 0x200   :  { %p277_p1 = scmp.ne.s32.totalorder %s370_s3, %s276_s26  ;;  %p280_p2 = scmp.lt.u32.totalorder %s276_s26, %s370_s3 }
 0x202   :  { %p282_p3 = pnand %p280_p2, %p277_p1 }
 0x204   :  { %285 = shalt.err (!%p282_p3)
}
 0x205   :  { %171 = dma.vmem_to_hbm [thread:$0]  %s169_s20, 16, %s370_s3, [#allocation4]  }
 0x206   :  { %290 = dma.done.wait [#allocation4], 16  }
 0x207   :  { %291 = vsyncadd [#allocation4], 4294967280 }
 0x208   :  { %175 = vsyncpa [#allocation3], 1 }
 0x209   :  { %176 = vsyncpa [#allocation6], 1 }
 0x20a   :  { %177 = vsyncpa [#allocation4], 1 }

</bundles_post_ra>
